<compile_context>
chip_gen: v6e
topology: v6e:2x2x1
jax: 0.10.0
libtpu: 0.0.40
codegen_flags: <defaults>
</compile_context>

<pallas_src>
import functools

import jax
import jax.numpy as jnp
from jax import lax
from jax.experimental import pallas as pl
from jax.experimental.pallas import tpu as pltpu


# ---------------------------------------------------------------------------
# Encoder kernel: SGC propagation + fused mu/logvar projection + reparam.
# ---------------------------------------------------------------------------
def _encoder_kernel(x_ref, adj_ref, mask_ref, eps_ref,
                    w_emb_ref, b_emb_ref, w_muvar_ref, b_muvar_ref,
                    z_ref, muvar_ref, *, hops: int):
    gps, n, fin = x_ref.shape
    d2 = z_ref.shape[-1]

    # Weights are grid-resident; read once per step.
    w_emb = w_emb_ref[...]        # (Fin, H1)   bf16
    b_emb = b_emb_ref[...]        # (1, H1)     f32
    w_muvar = w_muvar_ref[...]    # (H1, 2*D2)  bf16
    b_muvar = b_muvar_ref[...]    # (1, 2*D2)   f32

    # In-kernel bf16 cast of the adjacency (input stays f32 in HBM -> no
    # separate XLA convert pass over the dominant N^2 stream).
    adj = adj_ref[...].astype(jnp.bfloat16)            # (gps, N, N)

    # Batched node-dim contraction: out[g,i,f] = sum_j adj[g,i,j] * h[g,j,f]
    bdims = (((2,), (1,)), ((0,), (0,)))

    # ---- gc_emb (SGC): h1 = (A^hops x) W_emb + b_emb -----------------------
    h = x_ref[...]                                      # (gps, N, Fin) bf16
    for _ in range(hops):
        h = lax.dot_general(adj, h, bdims,
                            preferred_element_type=jnp.float32
                            ).astype(jnp.bfloat16)

    # Stacked projection over all graphs in the step: one (gps*N, Fin) matmul.
    h1 = jnp.dot(h.reshape(gps * n, fin), w_emb,
                 preferred_element_type=jnp.float32) + b_emb   # (gps*N, H1)
    h1dim = h1.shape[-1]

    # ---- gc_mu / gc_var fused: [mu|logvar] = (A^hops h1)[W_mu|W_var] + b ----
    p = h1.astype(jnp.bfloat16).reshape(gps, n, h1dim)
    for _ in range(hops):
        p = lax.dot_general(adj, p, bdims,
                            preferred_element_type=jnp.float32
                            ).astype(jnp.bfloat16)
    muvar = jnp.dot(p.reshape(gps * n, h1dim), w_muvar,
                    preferred_element_type=jnp.float32) + b_muvar  # (gps*N, 2D2)

    mu = muvar[:, :d2]
    logvar = muvar[:, d2:]

    # ---- re_parameterize + masked_fill (f32 epilogue) -----------------------
    std = jnp.exp(0.5 * logvar)
    eps = eps_ref[...].reshape(gps * n, d2)
    mask = mask_ref[...].reshape(gps * n, d2).astype(jnp.float32)
    z = (eps * std + mu) * mask

    z_ref[...] = z.reshape(gps, n, d2).astype(z_ref.dtype)
    muvar_ref[...] = muvar.reshape(gps, n, 2 * d2).astype(muvar_ref.dtype)


# ---------------------------------------------------------------------------
# Decoder kernel: adj_rec tile = sigmoid(z_q z_k^T)   (InnerProductDecoder;
# dropout is identity in eval mode).
# ---------------------------------------------------------------------------
def _decoder_kernel(zq_ref, zk_ref, out_ref):
    zq = zq_ref[0]                # (tq, D2) bf16
    zk = zk_ref[0]                # (tk, D2) bf16
    # Contract the last dims of both operands: MXU feeds the RHS transposed,
    # no explicit z.T / XLU transpose.
    logits = lax.dot_general(zq, zk, (((1,), (1,)), ((), ())),
                             preferred_element_type=jnp.float32)
    out_ref[0] = jax.nn.sigmoid(logits).astype(out_ref.dtype)


# ---------------------------------------------------------------------------
# Helpers
# ---------------------------------------------------------------------------
def _pick_tile(n: int, preferred: int, align: int) -> int:
    """Largest tile <= preferred that divides n and is a multiple of align,
    falling back to the full axis (always a legal block shape)."""
    if n <= preferred:
        return n
    t = (preferred // align) * align
    while t >= align:
        if n % t == 0:
            return t
        t -= align
    return n


def _round_up(v: int, m: int) -> int:
    return (v + m - 1) // m * m


def _vmem_capacity_bytes() -> int:
    try:
        return int(pltpu.get_tpu_info().vmem_capacity_bytes)
    except Exception:
        return 64 * 1024 * 1024          # v7x-conservative fallback


def _encoder_vmem_bytes(gps, n, fin, d2, h1):
    bf, f4 = 2, 4
    per_graph = n * (n * f4          # adj (f32 input; cast to bf16 in-kernel)
                     + fin * bf      # x
                     + d2 * bf       # mask (bf16)
                     + d2 * f4       # eps
                     + d2 * bf       # z out
                     + 2 * d2 * f4)  # mu|logvar out
    weights = fin * h1 * bf + h1 * 2 * d2 * bf + h1 * f4 + 2 * d2 * f4
    # bf16 adjacency copy + propagated-feature temporaries (compiler VMEM).
    temps = gps * n * (n * bf + 2 * max(fin, h1) * bf)
    # Inputs/outputs are double-buffered by the pipeline; add headroom for
    # MXU staging and other compiler temporaries.
    return 2 * (gps * per_graph + weights) + temps + (2 << 20)


# ---------------------------------------------------------------------------
# Wrapper
# ---------------------------------------------------------------------------
def gvae_forward(x, adj, node_mask, eps, params, *, hops: int,
                 graphs_per_step: int = 1, adj_rec_dtype=jnp.bfloat16):
    """GVAE forward pass.

    x: (B, N, Fin) f32, adj: (B, N, N) f32, node_mask: (B, N) {0,1},
    eps: (B, N, D2) f32.  Returns (adj_rec (B,N,N), mu (B,N,D2), logvar (B,N,D2)).
    """
    B, N, Fin = x.shape
    H1 = params["w_emb"].shape[1]
    D2 = params["w_mu"].shape[1]

    cap = _vmem_capacity_bytes()
    budget = int(cap * 0.9)

    # ---- graphs_per_step: fit VMEM, keep >= 2 grid steps (v7x megacore) -----
    gps = max(1, min(int(graphs_per_step), B))
    while gps > 1 and (B % gps != 0 or B // gps < 2):
        gps -= 1
    while gps > 1 and _encoder_vmem_bytes(gps, N, Fin, D2, H1) > budget:
        gps -= 1
        while gps > 1 and B % gps != 0:
            gps -= 1
    if gps > 1 and N % 8 != 0:
        gps = 1   # merged (gps*N, .) views need sublane-aligned per-graph rows

    # ---- host-side packing / casts ------------------------------------------
    x_bf = x.astype(jnp.bfloat16)
    adj_f32 = adj.astype(jnp.float32)           # cast to bf16 inside the kernel
    w_emb = params["w_emb"].astype(jnp.bfloat16)
    b_emb = params["b_emb"].reshape(1, H1).astype(jnp.float32)
    # Fused projection: one (H1, 2*D2) matmul instead of two (H1, D2) ones.
    w_muvar = jnp.concatenate(
        [params["w_mu"], params["w_var"]], axis=1).astype(jnp.bfloat16)
    b_muvar = jnp.concatenate(
        [params["b_mu"], params["b_var"]], axis=0).reshape(1, 2 * D2)
    b_muvar = b_muvar.astype(jnp.float32)
    # Lane-aligned mask; bf16 is exact for {0,1} and halves its stream.
    mask = jnp.broadcast_to(
        node_mask.astype(jnp.bfloat16)[..., None], (B, N, D2))
    eps = eps.astype(jnp.float32)

    def batched(*tail):
        return pl.BlockSpec((gps,) + tail,
                            lambda b, _t=len(tail): (b,) + (0,) * _t)

    def resident(*shape):
        # TODO(synk): single-buffer these constant-index weight blocks
        # (pipeline_mode=pl.Buffered(1)) once that path is validated.
        return pl.BlockSpec(shape, lambda b, _s=len(shape): (0,) * _s)

    enc_kernel = functools.partial(_encoder_kernel, hops=hops)

    # Generation-aware VMEM limit: never above ~90% of this chip's VMEM
    # (64 MiB on v7x), never below 32 MiB (raises v5e's 16 MiB default too).
    est = _encoder_vmem_bytes(gps, N, Fin, D2, H1)
    vmem_limit = int(min(max(est, 32 * 1024 * 1024), budget))

    z_bf, muvar = pl.pallas_call(
        enc_kernel,
        out_shape=(jax.ShapeDtypeStruct((B, N, D2), jnp.bfloat16),
                   jax.ShapeDtypeStruct((B, N, 2 * D2), jnp.float32)),
        grid_spec=pltpu.PrefetchScalarGridSpec(
            num_scalar_prefetch=0,
            grid=(B // gps,),
            in_specs=[
                batched(N, Fin),        # x (bf16)
                batched(N, N),          # adj (f32, cast in-kernel)
                batched(N, D2),         # node mask (pre-broadcast, bf16)
                batched(N, D2),         # eps (f32)
                resident(Fin, H1),      # w_emb
                resident(1, H1),        # b_emb
                resident(H1, 2 * D2),   # [w_mu | w_var]
                resident(1, 2 * D2),    # [b_mu | b_var]
            ],
            out_specs=[
                batched(N, D2),         # z (bf16, feeds the decoder)
                batched(N, 2 * D2),     # [mu | logvar] (f32)
            ],
        ),
        compiler_params=pltpu.CompilerParams(
            dimension_semantics=("parallel",),
            vmem_limit_bytes=vmem_limit),
    )(x_bf, adj_f32, mask, eps, w_emb, b_emb, w_muvar, b_muvar)

    mu = muvar[..., :D2]
    logvar = muvar[..., D2:]

    # ---- decoder: tiled sigmoid(z z^T), bf16 lane-dense output --------------
    # Pad the node dim to a multiple of 128 only when it would otherwise force
    # masked partial stores on the dominant N^2 output.
    Np = N
    z_dec = z_bf
    if N > 128 and N % 128 != 0:
        Np = _round_up(N, 128)
        z_dec = jnp.pad(z_bf, ((0, 0), (0, Np - N), (0, 0)))

    tq = _pick_tile(Np, 256, 8)       # 2nd-last output dim: multiple of 8
    tk = _pick_tile(Np, 1024, 128)    # last output dim: lane-dense, wide

    adj_rec = pl.pallas_call(
        _decoder_kernel,
        out_shape=jax.ShapeDtypeStruct((B, Np, Np), adj_rec_dtype),
        grid_spec=pltpu.PrefetchScalarGridSpec(
            num_scalar_prefetch=0,
            grid=(B, Np // tq, Np // tk),
            in_specs=[
                pl.BlockSpec((1, tq, D2), lambda b, q, k: (b, q, 0)),
                pl.BlockSpec((1, tk, D2), lambda b, q, k: (b, k, 0)),
            ],
            out_specs=pl.BlockSpec((1, tq, tk), lambda b, q, k: (b, q, k)),
        ),
        compiler_params=pltpu.CompilerParams(
            dimension_semantics=("parallel", "parallel", "parallel")),
    )(z_dec, z_dec)

    if Np != N:
        adj_rec = adj_rec[:, :N, :N]

    return adj_rec, mu, logvar


# ---------------------------------------------------------------------------
# Pure-JAX f32 reference of the same forward pass (sanity check).
# ---------------------------------------------------------------------------
def _reference(x, adj, node_mask, eps, params, *, hops):
    def sgc(h, a, w, b):
        for _ in range(hops):
            h = jnp.einsum("bij,bjk->bik", a, h)
        return jnp.einsum("bik,kd->bid", h, w) + b

    h1 = sgc(x, adj, params["w_emb"], params["b_emb"])
    mu = sgc(h1, adj, params["w_mu"], params["b_mu"])
    logvar = sgc(h1, adj, params["w_var"], params["b_var"])
    z = eps * jnp.exp(0.5 * logvar) + mu
    z = z * node_mask[..., None].astype(z.dtype)
    adj_rec = jax.nn.sigmoid(jnp.einsum("bid,bjd->bij", z, z))
    return adj_rec, mu, logvar


if __name__ == "__main__":
    # Small shapes consistent with the module.
    B, N = 2, 16            # batch of graphs, nodes per graph
    input_dim, hid_dim1, hid_dim2 = 8, 32, 16
    hops = 2
    # dropout is identity in eval mode -> omitted

    key = jax.random.PRNGKey(0)
    kx, ka, km, ke, k1, k2, k3 = jax.random.split(key, 7)

    x = jax.random.normal(kx, (B, N, input_dim), dtype=jnp.float32)
    # symmetric, row-normalized-ish adjacency
    a_raw = jax.random.uniform(ka, (B, N, N), dtype=jnp.float32)
    adj = (a_raw + jnp.swapaxes(a_raw, -1, -2)) * 0.5
    adj = adj / jnp.sum(adj, axis=-1, keepdims=True)
    node_mask = (jax.random.uniform(km, (B, N)) > 0.2).astype(jnp.float32)
    eps = jax.random.normal(ke, (B, N, hid_dim2), dtype=jnp.float32)

    # Deterministic parameter init (synthetic, no checkpoint load).
    params = {
        "w_emb": 0.1 * jax.random.normal(k1, (input_dim, hid_dim1), jnp.float32),
        "b_emb": jnp.zeros((hid_dim1,), jnp.float32),
        "w_mu": 0.1 * jax.random.normal(k2, (hid_dim1, hid_dim2), jnp.float32),
        "b_mu": jnp.zeros((hid_dim2,), jnp.float32),
        "w_var": 0.1 * jax.random.normal(k3, (hid_dim1, hid_dim2), jnp.float32),
        "b_var": jnp.zeros((hid_dim2,), jnp.float32),
    }

    adj_rec, mu, logvar = gvae_forward(x, adj, node_mask, eps, params,
                                       hops=hops, graphs_per_step=1)
    jax.block_until_ready((adj_rec, mu, logvar))

    # Sanity check against a pure-JAX f32 reference.  Tolerances account for
    # the bf16 MXU inputs and the bf16 adjacency reconstruction (accumulation
    # and the epilogue stay in f32).
    r_adj, r_mu, r_lv = _reference(x, adj, node_mask, eps, params, hops=hops)
    assert jnp.allclose(adj_rec.astype(jnp.float32), r_adj, atol=4e-2), "adj mismatch"
    assert jnp.allclose(mu, r_mu, atol=2e-2), "mu mismatch"
    assert jnp.allclose(logvar, r_lv, atol=2e-2), "logvar mismatch"
    assert adj_rec.shape == (B, N, N)
    assert mu.shape == (B, N, hid_dim2) and logvar.shape == (B, N, hid_dim2)

    print("KERNEL_OK")
</pallas_src>

<mosaic_0001>
module attributes {stable_mosaic.version = 11 : i64} {
  func.func @_encoder_kernel(%arg0: i32, %arg1: memref<1x16x8xbf16, #tpu.memory_space<vmem>>, %arg2: memref<1x16x16xf32, #tpu.memory_space<vmem>>, %arg3: memref<1x16x16xbf16, #tpu.memory_space<vmem>>, %arg4: memref<1x16x16xf32, #tpu.memory_space<vmem>>, %arg5: memref<8x32xbf16, #tpu.memory_space<vmem>>, %arg6: memref<1x32xf32, #tpu.memory_space<vmem>>, %arg7: memref<32x32xbf16, #tpu.memory_space<vmem>>, %arg8: memref<1x32xf32, #tpu.memory_space<vmem>>, %arg9: memref<1x16x16xbf16, #tpu.memory_space<vmem>>, %arg10: memref<1x16x32xf32, #tpu.memory_space<vmem>>) attributes {dimension_semantics = [#tpu.dimension_semantics<parallel>], iteration_bounds = array<i64: 2>, scalar_prefetch = 0 : i64, scratch_operands = 0 : i64, tpu.core_type = #tpu.core_type<tc>, window_params = [{transform_indices = @transform_0, window_bounds = array<i64: 1, 16, 8>}, {transform_indices = @transform_1, window_bounds = array<i64: 1, 16, 16>}, {transform_indices = @transform_2, window_bounds = array<i64: 1, 16, 16>}, {transform_indices = @transform_3, window_bounds = array<i64: 1, 16, 16>}, {pipeline_mode = #tpu.pipeline_mode<synchronous>, transform_indices = @transform_4, window_bounds = array<i64: 8, 32>}, {pipeline_mode = #tpu.pipeline_mode<synchronous>, transform_indices = @transform_5, window_bounds = array<i64: 1, 32>}, {pipeline_mode = #tpu.pipeline_mode<synchronous>, transform_indices = @transform_6, window_bounds = array<i64: 32, 32>}, {pipeline_mode = #tpu.pipeline_mode<synchronous>, transform_indices = @transform_7, window_bounds = array<i64: 1, 32>}, {transform_indices = @transform_8, window_bounds = array<i64: 1, 16, 16>}, {transform_indices = @transform_9, window_bounds = array<i64: 1, 16, 32>}]} {
    %c0 = arith.constant 0 : index
    %c0_0 = arith.constant 0 : index
    %0 = vector.load %arg5[%c0, %c0_0] : memref<8x32xbf16, #tpu.memory_space<vmem>>, vector<8x32xbf16>
    %c0_1 = arith.constant 0 : index
    %c0_2 = arith.constant 0 : index
    %1 = vector.load %arg6[%c0_1, %c0_2] : memref<1x32xf32, #tpu.memory_space<vmem>>, vector<1x32xf32>
    %c0_3 = arith.constant 0 : index
    %c0_4 = arith.constant 0 : index
    %2 = vector.load %arg7[%c0_3, %c0_4] : memref<32x32xbf16, #tpu.memory_space<vmem>>, vector<32x32xbf16>
    %c0_5 = arith.constant 0 : index
    %c0_6 = arith.constant 0 : index
    %3 = vector.load %arg8[%c0_5, %c0_6] : memref<1x32xf32, #tpu.memory_space<vmem>>, vector<1x32xf32>
    %c0_7 = arith.constant 0 : index
    %c0_8 = arith.constant 0 : index
    %c0_9 = arith.constant 0 : index
    %4 = vector.load %arg2[%c0_7, %c0_8, %c0_9] : memref<1x16x16xf32, #tpu.memory_space<vmem>>, vector<1x16x16xf32>
    %5 = arith.truncf %4 : vector<1x16x16xf32> to vector<1x16x16xbf16>
    %c0_10 = arith.constant 0 : index
    %c0_11 = arith.constant 0 : index
    %c0_12 = arith.constant 0 : index
    %6 = vector.load %arg1[%c0_10, %c0_11, %c0_12] : memref<1x16x8xbf16, #tpu.memory_space<vmem>>, vector<1x16x8xbf16>
    %cst = arith.constant dense<0.000000e+00> : vector<1x16x8xf32>
    %7 = tpu.matmul %5, %6, %cst {dimension_numbers = #tpu.dot_dimension_numbers<[2], [1], [1], [2], [0, 0, 0, 1, 1, 2], [0], [0]>} : vector<1x16x16xbf16>, vector<1x16x8xbf16>, vector<1x16x8xf32> -> vector<1x16x8xf32>
    %8 = arith.truncf %7 : vector<1x16x8xf32> to vector<1x16x8xbf16>
    %cst_13 = arith.constant dense<0.000000e+00> : vector<1x16x8xf32>
    %9 = tpu.matmul %5, %8, %cst_13 {dimension_numbers = #tpu.dot_dimension_numbers<[2], [1], [1], [2], [0, 0, 0, 1, 1, 2], [0], [0]>} : vector<1x16x16xbf16>, vector<1x16x8xbf16>, vector<1x16x8xf32> -> vector<1x16x8xf32>
    %10 = arith.truncf %9 : vector<1x16x8xf32> to vector<1x16x8xbf16>
    %11 = vector.shape_cast %10 : vector<1x16x8xbf16> to vector<16x8xbf16>
    %cst_14 = arith.constant dense<0.000000e+00> : vector<16x32xf32>
    %12 = tpu.matmul %11, %0, %cst_14 {dimension_numbers = #tpu.dot_dimension_numbers<[1], [0], [0], [1], [0, 0, 1, 1], [], []>} : vector<16x8xbf16>, vector<8x32xbf16>, vector<16x32xf32> -> vector<16x32xf32>
    %13 = vector.broadcast %1 : vector<1x32xf32> to vector<16x32xf32>
    %14 = arith.addf %12, %13 : vector<16x32xf32>
    %15 = arith.truncf %14 : vector<16x32xf32> to vector<16x32xbf16>
    %16 = vector.shape_cast %15 : vector<16x32xbf16> to vector<1x16x32xbf16>
    %cst_15 = arith.constant dense<0.000000e+00> : vector<1x16x32xf32>
    %17 = tpu.matmul %5, %16, %cst_15 {dimension_numbers = #tpu.dot_dimension_numbers<[2], [1], [1], [2], [0, 0, 0, 1, 1, 2], [0], [0]>} : vector<1x16x16xbf16>, vector<1x16x32xbf16>, vector<1x16x32xf32> -> vector<1x16x32xf32>
    %18 = arith.truncf %17 : vector<1x16x32xf32> to vector<1x16x32xbf16>
    %cst_16 = arith.constant dense<0.000000e+00> : vector<1x16x32xf32>
    %19 = tpu.matmul %5, %18, %cst_16 {dimension_numbers = #tpu.dot_dimension_numbers<[2], [1], [1], [2], [0, 0, 0, 1, 1, 2], [0], [0]>} : vector<1x16x16xbf16>, vector<1x16x32xbf16>, vector<1x16x32xf32> -> vector<1x16x32xf32>
    %20 = arith.truncf %19 : vector<1x16x32xf32> to vector<1x16x32xbf16>
    %21 = vector.shape_cast %20 : vector<1x16x32xbf16> to vector<16x32xbf16>
    %cst_17 = arith.constant dense<0.000000e+00> : vector<16x32xf32>
    %22 = tpu.matmul %21, %2, %cst_17 {dimension_numbers = #tpu.dot_dimension_numbers<[1], [0], [0], [1], [0, 0, 1, 1], [], []>} : vector<16x32xbf16>, vector<32x32xbf16>, vector<16x32xf32> -> vector<16x32xf32>
    %23 = vector.broadcast %3 : vector<1x32xf32> to vector<16x32xf32>
    %24 = arith.addf %22, %23 : vector<16x32xf32>
    %25 = vector.extract_strided_slice %24 {offsets = [0, 0], sizes = [16, 16], strides = [1, 1]} : vector<16x32xf32> to vector<16x16xf32>
    %26 = vector.extract_strided_slice %24 {offsets = [0, 16], sizes = [16, 16], strides = [1, 1]} : vector<16x32xf32> to vector<16x16xf32>
    %cst_18 = arith.constant 5.000000e-01 : f32
    %27 = vector.broadcast %cst_18 : f32 to vector<16x16xf32>
    %28 = arith.mulf %27, %26 : vector<16x16xf32>
    %29 = math.exp %28 : vector<16x16xf32>
    %c0_19 = arith.constant 0 : index
    %c0_20 = arith.constant 0 : index
    %c0_21 = arith.constant 0 : index
    %30 = vector.load %arg4[%c0_19, %c0_20, %c0_21] : memref<1x16x16xf32, #tpu.memory_space<vmem>>, vector<1x16x16xf32>
    %31 = vector.shape_cast %30 : vector<1x16x16xf32> to vector<16x16xf32>
    %c0_22 = arith.constant 0 : index
    %c0_23 = arith.constant 0 : index
    %c0_24 = arith.constant 0 : index
    %32 = vector.load %arg3[%c0_22, %c0_23, %c0_24] : memref<1x16x16xbf16, #tpu.memory_space<vmem>>, vector<1x16x16xbf16>
    %33 = vector.shape_cast %32 : vector<1x16x16xbf16> to vector<16x16xbf16>
    %34 = arith.extf %33 : vector<16x16xbf16> to vector<16x16xf32>
    %35 = arith.mulf %31, %29 : vector<16x16xf32>
    %36 = arith.addf %35, %25 : vector<16x16xf32>
    %37 = arith.mulf %36, %34 : vector<16x16xf32>
    %38 = vector.shape_cast %37 : vector<16x16xf32> to vector<1x16x16xf32>
    %39 = arith.truncf %38 : vector<1x16x16xf32> to vector<1x16x16xbf16>
    %c0_25 = arith.constant 0 : index
    %c0_26 = arith.constant 0 : index
    %c0_27 = arith.constant 0 : index
    %40 = vector.load %arg9[%c0_25, %c0_26, %c0_27] : memref<1x16x16xbf16, #tpu.memory_space<vmem>>, vector<1x16x16xbf16>
    tpu.vector_store %arg9[%c0_25, %c0_26, %c0_27], %39 {strides = array<i32>} : memref<1x16x16xbf16, #tpu.memory_space<vmem>>, vector<1x16x16xbf16>,
    %41 = vector.shape_cast %24 : vector<16x32xf32> to vector<1x16x32xf32>
    %c0_28 = arith.constant 0 : index
    %c0_29 = arith.constant 0 : index
    %c0_30 = arith.constant 0 : index
    %42 = vector.load %arg10[%c0_28, %c0_29, %c0_30] : memref<1x16x32xf32, #tpu.memory_space<vmem>>, vector<1x16x32xf32>
    tpu.vector_store %arg10[%c0_28, %c0_29, %c0_30], %41 {strides = array<i32>} : memref<1x16x32xf32, #tpu.memory_space<vmem>>, vector<1x16x32xf32>,
    return
  }
  func.func @transform_0(%arg0: i32) -> (i32, i32, i32) {
    %c0_i32 = arith.constant 0 : i32
    %c0_i32_0 = arith.constant 0 : i32
    %c0_i32_1 = arith.constant 0 : i32
    return %arg0, %c0_i32, %c0_i32_0 : i32, i32, i32
  }
  func.func @transform_1(%arg0: i32) -> (i32, i32, i32) {
    %c0_i32 = arith.constant 0 : i32
    %c0_i32_0 = arith.constant 0 : i32
    %c0_i32_1 = arith.constant 0 : i32
    return %arg0, %c0_i32, %c0_i32_0 : i32, i32, i32
  }
  func.func @transform_2(%arg0: i32) -> (i32, i32, i32) {
    %c0_i32 = arith.constant 0 : i32
    %c0_i32_0 = arith.constant 0 : i32
    %c0_i32_1 = arith.constant 0 : i32
    return %arg0, %c0_i32, %c0_i32_0 : i32, i32, i32
  }
  func.func @transform_3(%arg0: i32) -> (i32, i32, i32) {
    %c0_i32 = arith.constant 0 : i32
    %c0_i32_0 = arith.constant 0 : i32
    %c0_i32_1 = arith.constant 0 : i32
    return %arg0, %c0_i32, %c0_i32_0 : i32, i32, i32
  }
  func.func @transform_4(%arg0: i32) -> (i32, i32) {
    %c0_i32 = arith.constant 0 : i32
    %c0_i32_0 = arith.constant 0 : i32
    %c0_i32_1 = arith.constant 0 : i32
    return %c0_i32, %c0_i32_0 : i32, i32
  }
  func.func @transform_5(%arg0: i32) -> (i32, i32) {
    %c0_i32 = arith.constant 0 : i32
    %c0_i32_0 = arith.constant 0 : i32
    %c0_i32_1 = arith.constant 0 : i32
    return %c0_i32, %c0_i32_0 : i32, i32
  }
  func.func @transform_6(%arg0: i32) -> (i32, i32) {
    %c0_i32 = arith.constant 0 : i32
    %c0_i32_0 = arith.constant 0 : i32
    %c0_i32_1 = arith.constant 0 : i32
    return %c0_i32, %c0_i32_0 : i32, i32
  }
  func.func @transform_7(%arg0: i32) -> (i32, i32) {
    %c0_i32 = arith.constant 0 : i32
    %c0_i32_0 = arith.constant 0 : i32
    %c0_i32_1 = arith.constant 0 : i32
    return %c0_i32, %c0_i32_0 : i32, i32
  }
  func.func @transform_8(%arg0: i32) -> (i32, i32, i32) {
    %c0_i32 = arith.constant 0 : i32
    %c0_i32_0 = arith.constant 0 : i32
    %c0_i32_1 = arith.constant 0 : i32
    return %arg0, %c0_i32, %c0_i32_0 : i32, i32, i32
  }
  func.func @transform_9(%arg0: i32) -> (i32, i32, i32) {
    %c0_i32 = arith.constant 0 : i32
    %c0_i32_0 = arith.constant 0 : i32
    %c0_i32_1 = arith.constant 0 : i32
    return %arg0, %c0_i32, %c0_i32_0 : i32, i32, i32
  }
}

</mosaic_0001>

<bundles_post_ra>
// kernel: tpu_custom_call.1
= control target key start
LH: loop header
LB: loop body
LE: loop exit
PB: predicated region body
PF: predicated region fallthrough
CT: control target
= control target key end

     0   :  { %s1753_s0 = inlined_call_operand.vmem [shape: bf16[2,16,8], index: 0, kind: input, shape index: {}]   ;;  %s1754_s1 = inlined_call_operand.hbm [shape: f32[2,16,16], index: 1, kind: input, shape index: {}]   ;;  %s1755_s2 = inlined_call_operand.vmem [shape: bf16[2,16,16], index: 2, kind: input, shape index: {}]   ;;  %s1756_s3 = inlined_call_operand.hbm [shape: f32[2,16,16], index: 3, kind: input, shape index: {}]   ;;  %s1757_s4 = inlined_call_operand.hbm [shape: bf16[8,32], index: 4, kind: input, shape index: {}]   ;;  %s1758_s5 = inlined_call_operand.vmem [shape: f32[1,32], index: 5, kind: input, shape index: {}]   ;;  %s1759_s6 = inlined_call_operand.vmem [shape: bf16[32,32], index: 6, kind: input, shape index: {}]   ;;  %s1760_s7 = inlined_call_operand.vmem [shape: f32[1,32], index: 7, kind: input, shape index: {}]   ;;  %s1761_s8 = inlined_call_operand.hbm [shape: bf16[2,16,16], index: 8, kind: output, shape index: {0}]   ;;  %s1762_s9 = inlined_call_operand.hbm [shape: f32[2,16,32], index: 9, kind: output, shape index: {1}]  }
   0x1   :  { %1771 = sst [smem:[#allocation20_spill]] %s1754_s1 }
   0x2   :  { %1772 = sst [smem:[#allocation21_spill]] %s1757_s4 }
   0x3   :  { %15 = vsyncpa [#allocation3], 0 }
   0x4   :  { %17 = vsyncpa [#allocation3 + $0x1], 0 }
   0x5   :  { %18 = vsyncpa [#allocation6], 0 }
   0x6   :  { %20 = vsyncpa [#allocation6 + $0x1], 0 }
   0x7   :  { %21 = vsyncpa [#allocation4], 0 }
   0x8   :  { %23 = vsyncpa [#allocation4 + $0x1], 0 }
   0x9   :  { %24 = vsyncpa [#allocation10], 0 }
   0xa   :  { %26 = vsyncpa [#allocation10 + $0x1], 0  ;;  %s1436_s30 = smov 0   ;;  %s1438_s10 = smov 0  }
   0xb   :  { %s1440_s11 = smov 0   ;;  %s1442_s12 = smov 0  }
   0xc LB: > { %1773 = sst [smem:[#allocation16_spill]] %s1366_s11  ;;  %s1457_s13 = sadd.s32 4294967295, %s1370_s12   ;;  %s1370_s12 = sphi %s1442_s12, %s1795_s12   ;;  %s1366_s11 = sphi %s1440_s11, %s1797_s11   ;;  %s1362_s10 = sphi %s1438_s10, %s1799_s10   ;;  %s1358_s30 = sphi %s1436_s30, %s1798_s30  }
   0xd   : > { %s999_s14 = sadd.s32 4294967294, %s1370_s12   ;;  %s1461_s15 = sadd.s32 1, %s1370_s12  }
   0xe   : > { %1774 = sst [smem:[#allocation17_spill]] %s1461_s15  ;;  %s65_s16 = sadd.s32 1, %s1366_s11 }
   0xf   : > { %s62_s17 = ssub.s32 %s1370_s12, %s1461_s15  ;;  %p72_p0 = scmp.ne.s32.totalorder %s1366_s11, %s1362_s10 }
  0x10   : > { %p63_p1 = scmp.eq.s32.totalorder %s62_s17, 0  ;;  %p73_p2 = scmp.eq.s32.totalorder %s1370_s12, 0 }
  0x11   : > { %p78_p3 = scmp.ne.s32.totalorder %s1362_s10, %s1358_s30  ;;  %p1763_p4 = scmp.eq.s32.totalorder %s1457_s13, 0 }
  0x12   : > { %s1473_s18 = scalar_select %p63_p1, %s1366_s11, %s65_s16  }
  0x13   : > { %p1475_p5 = por %p73_p2, %p72_p0  ;;  %p1481_p6 = por %p1763_p4, %p78_p3 }
  0x14   : > { %1775 = sst [smem:[#allocation18_spill]] %s1473_s18  ;;  %p238_p7 = scmp.eq.s32.totalorder %s1457_s13, 1 }
  0x15   : > { %s1777_s20 = scalar_select %p1481_p6, 1, 0 }
  0x16   : > { %p244_p8 = scmp.eq.s32.totalorder %s999_s14, 1  ;;  %p1000_p9 = scmp.ge.s32.totalorder %s1370_s12, 1 }
  0x17   : > { %p277_p10 = scmp.lt.s32.totalorder %s1370_s12, 3  ;;  %p1488_p11 = por %p238_p7, %p72_p0 }
  0x18   : > { %p1492_p12 = por %p244_p8, %p78_p3  ;;  %s1372_s24 = smov [#allocation7]  }
  0x19   : > { %s1778_s21 = scalar_select %p1488_p11, 1, 0 }
  0x1a   : > { %s1779_s22 = scalar_select %p1492_p12, 1, 0 }
  0x1b   : > { %p1496_p13 = pnand %p1000_p9, %p277_p10  ;;  %s290_s25 = sshll.u32 %s1372_s24, 4  ;;  %s291_s25 = int_to_ptr.vmem [resolvable:$true] %s290_s25 }
  0x1c   : > { %1780 = sst [smem:[#allocation19_spill]] %s1779_s22  ;;  %p1134_p4 = scmp.lt.s32.totalorder %s1370_s12, 2 }
  0x1d   : > { %p1115_p2 = pneg %p1496_p13  ;;  %p1782_p0 = scmp.eq.s32.totalorder %s1457_s13, 0 }
  0x1e   : > { %s318_s27 = sand.u32 1, %s1366_s11   ;;  %p1513_p3 = pnand %p1134_p4, %p1475_p5 }
  0x1f   : > { %p1506_p7 = pnand %p1115_p2, %p1782_p0  ;;  %s1517_s29 = sshll.u32 %s318_s27, 4 }
  0x20   : > { %s1197_s14 = scalar_lea.vmem %s291_s25, 64  ;;  %p1205_p12 = scmp.lt.s32.totalorder %s291_s25, %s291_s25 }
  0x21   : > { %p1188_p8 = pneg %p1506_p7  ;;  %p1198_p9 = scmp.ne.s32.totalorder %s291_s25, %s1197_s14 }
  0x22   : > { %p1206_p2 = scmp.lt.s32.totalorder %s1197_s14, %s1197_s14 }
  0x23   : > { %p1200_p10 = pnand %p1198_p9, %p1188_p8 }
  0x24   : > { %p1207_p0 = por %p1206_p2, %p1205_p12 }
  0x25   : > { %p1201_p1 = pneg %p1200_p10 }
  0x27   : > { %p1208_p11 = pnand %p1207_p0, %p1201_p1 }
  0x29   : > { %1211 = shalt.err (!%p1208_p11)
}
  0x2a   : > { %s1785_s4 = sld [smem:[#allocation21_spill]]  ;;  %s1768_s19 = sshll.u32 %s1370_s12, 8 }
  0x2b   : > { %s322_s24 = scalar_lea.vmem [#allocation2], %s1517_s29  ;;  %s1786_s1 = sld [smem:[#allocation20_spill]] }
  0x2c   : > { %s329_s18 = sshll.u32 %s322_s24, 4  ;;  %s1537_s26 = scalar_lea.sflag [#allocation3], %s318_s27  ;;  %s1535_s18 = int_to_ptr.vmem [resolvable:$true] %s329_s18 }
  0x2d   : > { %p1214_p5 = pneg %p1513_p3 }
  0x30   : > { %1118 = dma.hbm_to_vmem [thread:$0]  (!%p1506_p7), %s1785_s4, 64, %s291_s25, [#allocation6]  }
  0x31   : > { %s1533_s15 = scalar_lea.hbm %s1786_s1, %s1768_s19  ;;  %s1217_s11 = scalar_lea.hbm %s1786_s1, 512 }
  0x32   : > { %s1212_s16 = scalar_lea.hbm %s1533_s15, 256  ;;  %p1218_p1 = scmp.lt.s32.totalorder %s1533_s15, %s1786_s1 }
  0x33   : > { %p1213_p4 = scmp.ne.s32.totalorder %s1533_s15, %s1212_s16  ;;  %p1219_p7 = scmp.lt.s32.totalorder %s1217_s11, %s1212_s16 }
  0x35   : > { %p1215_p11 = pnand %p1214_p5, %p1213_p4  ;;  %p1220_p8 = por %p1219_p7, %p1218_p1 }
  0x37   : > { %p1216_p12 = pneg %p1215_p11 }
  0x39   : > { %p1221_p9 = pnand %p1220_p8, %p1216_p12 }
  0x3b   : > { %1224 = shalt.err (!%p1221_p9)
}
  0x3c   : > { %s1225_s27 = scalar_lea.vmem %s1535_s18, 256  ;;  %s1373_s25 = smov [#allocation2]  }
  0x3d   : > { %p1226_p10 = scmp.ne.s32.totalorder %s1535_s18, %s1225_s27  ;;  %s1230_s17 = sshll.u32 %s1373_s25, 4  ;;  %s1231_s17 = int_to_ptr.vmem [resolvable:$false] %s1230_s17 }
  0x3e   : > { %s1232_s19 = scalar_lea.vmem %s1231_s17, 512  ;;  %p1233_p4 = scmp.lt.s32.totalorder %s1535_s18, %s1231_s17 }
  0x3f   : > { %p1228_p2 = pnand %p1226_p10, %p1214_p5  ;;  %p1234_p11 = scmp.lt.s32.totalorder %s1232_s19, %s1225_s27 }
  0x41   : > { %p1229_p0 = pneg %p1228_p2  ;;  %p1235_p6 = por %p1234_p11, %p1233_p4 }
  0x43   : > { %p1236_p1 = pnand %p1235_p6, %p1229_p0 }
  0x45   : > { %1239 = shalt.err (!%p1236_p1)
}
  0x46   : > { %s1374_s16 = smov 128   ;;  %s1375_s11 = smov 8  }
  0x47   : > { %1122 = dma.hbm_to_vmem [thread:$0]  (!%p1513_p3), %s1533_s15, 256, %s1535_s18, %s1537_s26, %s1374_s16, %s1374_s16, %s1375_s11  }
  0x48   : > { %s1787_s24 = sshll.u32 %s1370_s12, 8  ;;  %s351_s25 = scalar_lea.vmem [#allocation5], %s1517_s29 }
  0x49   : > { %s1572_s27 = scalar_lea.hbm %s1756_s3, %s1787_s24  ;;  %s358_s17 = sshll.u32 %s351_s25, 4  ;;  %s1576_s17 = int_to_ptr.vmem [resolvable:$true] %s358_s17 }
  0x4a   : > { %s347_s1 = sand.u32 1, %s1370_s12   ;;  %s1240_s22 = scalar_lea.hbm %s1572_s27, 256 }
  0x4b   : > { %s348_s4 = scalar_lea.sflag [#allocation6], %s347_s1  ;;  %p1241_p6 = scmp.ne.s32.totalorder %s1572_s27, %s1240_s22 }
  0x4c   : > { %s1245_s26 = scalar_lea.hbm %s1756_s3, 512  ;;  %p1246_p8 = scmp.lt.s32.totalorder %s1572_s27, %s1756_s3 }
  0x4d   : > { %p1243_p12 = pnand %p1241_p6, %p1214_p5  ;;  %p1247_p9 = scmp.lt.s32.totalorder %s1245_s26, %s1240_s22 }
  0x4f   : > { %p1244_p7 = pneg %p1243_p12  ;;  %p1248_p10 = por %p1247_p9, %p1246_p8 }
  0x51   : > { %p1249_p2 = pnand %p1248_p10, %p1244_p7 }
  0x53   : > { %1252 = shalt.err (!%p1249_p2)
}
  0x54   : > { %s1253_s1 = scalar_lea.vmem %s1576_s17, 256  ;;  %s1376_s29 = smov [#allocation5]  }
  0x55   : > { %p1254_p0 = scmp.ne.s32.totalorder %s1576_s17, %s1253_s1  ;;  %s1258_s14 = sshll.u32 %s1376_s29, 4  ;;  %s1259_s14 = int_to_ptr.vmem [resolvable:$false] %s1258_s14 }
  0x56   : > { %s1260_s25 = scalar_lea.vmem %s1259_s14, 512  ;;  %p1261_p1 = scmp.lt.s32.totalorder %s1576_s17, %s1259_s14 }
  0x57   : > { %p1256_p4 = pnand %p1254_p0, %p1214_p5  ;;  %p1262_p6 = scmp.lt.s32.totalorder %s1260_s25, %s1253_s1 }
  0x59   : > { %p1257_p11 = pneg %p1256_p4  ;;  %p1263_p12 = por %p1262_p6, %p1261_p1 }
  0x5b   : > { %p1264_p8 = pnand %p1263_p12, %p1257_p11 }
  0x5d   : > { %1267 = shalt.err (!%p1264_p8)
}
  0x5e   : > { %1125 = dma.hbm_to_vmem [thread:$0]  (!%p1513_p3), %s1572_s27, 256, %s1576_s17, %s348_s4, %s1374_s16, %s1374_s16, %s1375_s11  }
  0x5f   : > { %370 = sbr.rel (%p1496_p13) target bundleno = 1477 (0x5c5), region = 52  ;;  %s1606_s22 = sand.u32 (!%p1496_p13), 1, %s1362_s10  }
  0x60   : > { %s1609_s15 = sshll.u32 (!%p1496_p13), %s1606_s22, 4  ;;  %s373_s18 = scalar_lea.sflag (!%p1496_p13), [#allocation3], %s1606_s22 }
  0x61   : > { %s376_s28 = scalar_lea.vmem (!%p1496_p13), [#allocation2], %s1609_s15  ;;  %p1788_p5 = scmp.ne.s32.totalorder (!%p1496_p13), %s1777_s20, 0 }
  0x64   : > { %1337 = dma.done.wait (%p1788_p5), %s373_s18, 256  }
  0x65   : > { %1339 = vsyncadd (%p1788_p5), %s373_s18, 4294967040  ;;  %s381_s4 = sand.u32 1, %s1457_s13   ;;  %s385_s16 = scalar_lea.vmem [#allocation5], %s1609_s15 }
  0x66   : > { %s382_s23 = scalar_lea.sflag [#allocation6], %s381_s4 }
  0x67   : > { %1341 = dma.done.wait (%p1788_p5), %s382_s23, 256  }
  0x68   : > { %1343 = vsyncadd (%p1788_p5), %s382_s23, 4294967040  ;;  %p1789_p13 = scmp.eq.s32.totalorder %s1457_s13, 0 }
  0x6a   : > { %1345 = dma.done.wait (%p1789_p13), [#allocation6], 64   ;;  %p1790_p3 = pmov %p1789_p13 }
  0x6b   : > { %p444_p7 = scmp.lt.s32.totalorder %s1457_s13, 1  ;;  %v1377_v0 = vmov 0.0   ;;  %vm1378_vm0 = vmmov 0   ;;  %v462_v2 = vld [vmem:[%s376_s28] sm:$0xff]  ;;  %v463_v3 = vld [vmem:[%s376_s28 + $0x8] sm:$0xff]  ;;  %vm473_vm1 = vcmask 130048  }
  0x6c   : > { %1347 = vsyncadd (%p1790_p3), [#allocation6], 4294967232  ;;  %1065 = vmatprep.subr.bf16.mxu0 %v1377_v0  ;;  %1067 = vmatprep.mubr.msk.bf16.mxu0 %vm1378_vm0, %v1377_v0  ;;  %v464_v4 = vpack.c.bf16 %v463_v3, %v462_v2  ;;  %v455_v10 = vld [vmem:[#allocation7] sm:$0xf]  ;;  %vm571_vm2 = vcmask 1043456   ;;  %vm567_vm3 = vcmask 64512  }
  0x6d   : > { %s1630_s11 = scalar_select %p444_p7, %s1457_s13, 1  ;;  %1071 = vmatprep.subr.bf16.mxu1 %v1377_v0  ;;  %1073 = vmatprep.mubr.msk.bf16.mxu1 %vm1378_vm0, %v1377_v0  ;;  %v573_v11 = vsel %vm571_vm2, %v455_v10, 0  ;;  %v1022_v18 = vld [vmem:[%s1758_s5] ss:$0 sm:$0xff]  ;;  %v1180_v30 = vld [vmem:[%s1759_s6 + $0x8] sm:$0xff]   ;;  %vm719_vm4 = vcmask 261120  }
  0x6e   : > { %v1181_v31 = vld [vmem:[%s1759_s6] sm:$0xff]   ;;  %s443_s4 = scalar_lea.vmem [#allocation9], %s1609_s15  ;;  %s1379_s27 = smov 112  }
  0x6f   : > { %s1042_s20 = sshll.u32 %s1630_s11, 3  ;;  %v1026_v37 = vld [vmem:[%s1760_s7] ss:$0 sm:$0xff]  ;;  %s838_s23 = sshll.u32 %s443_s4, 4  ;;  %s1663_s23 = int_to_ptr.vmem [resolvable:$true] %s838_s23 }
  0x70   : > { %s448_s26 = scalar_lea.vmem %s1753_s0, %s1042_s20  ;;  %s1047_s17 = sshll.u32 %s1457_s13, 8 }
  0x71   : > { %v1179_v1 = vld [vmem:[%s448_s26] sm:$0xff]   ;;  %s1669_s19 = scalar_lea.hbm %s1762_s9, %s1047_s17  ;;  %s809_s1 = scalar_lea.sflag [#allocation10], %s1606_s22 }
  0x72   : > { %1066 = vmatpush3.bf16.msra.mxu0 %v1179_v1  ;;  %s1268_s29 = scalar_lea.vmem %s1663_s23, 256  ;;  %p1791_p10 = scmp.ne.s32.totalorder %s1778_s21, 0 }
  0x73   : > { %1077 = vmatprep.subr.bf16.mxu0 %v1377_v0  ;;  %p1269_p9 = scmp.ne.s32.totalorder %s1663_s23, %s1268_s29  ;;  %s1380_s14 = smov [#allocation9]  }
  0x74   : > { %s1272_s25 = sshll.u32 %s1380_s14, 4  ;;  %s1273_s25 = int_to_ptr.vmem [resolvable:$false] %s1272_s25 }
  0x75   : > { %1068 = vmatmul.mubr.msk.bf16.vlgmr.msra.gmra.mxu0 %vm473_vm1, %v464_v4  ;;  %p1270_p2 = pnand %p1269_p9, %p1791_p10  ;;  %s1274_s18 = scalar_lea.vmem %s1273_s25, 512 }
  0x76   : > { %1079 = vmatprep.mubr.msk.bf16.mxu0 %vm1378_vm0, %v1377_v0  ;;  %1078 = vmatpush3.bf16.msra.mxu0 %v573_v11  ;;  %p1275_p4 = scmp.lt.s32.totalorder %s1663_s23, %s1273_s25  ;;  %p1276_p11 = scmp.lt.s32.totalorder %s1274_s18, %s1268_s29 }
  0x77   : > { %1089 = vmatprep.subr.bf16.mxu0 %v1377_v0  ;;  %p1271_p0 = pneg %p1270_p2 }
  0x78   : > { %p1277_p1 = por %p1276_p11, %p1275_p4 }
  0x7a   : > { %p1278_p6 = pnand %p1277_p1, %p1271_p0 }
 0x135   : > { %v511_v5 = vpop.f32.mrf.mxu0 }
 0x137   : > { %v1069_v6 = vpop.f32.mrf.mxu0 }
 0x139   : > { %v514_v7 = vpop.f32.mrf.mxu0 }
 0x13a   : > { %v518_v8 = vpack.c.bf16 %v514_v7, %v511_v5 }
 0x13b   : > { %v1070_v9 = vpop.f32.mrf.mxu0 }
 0x13c   : > { %1072 = vmatpush3.bf16.msra.mxu1 %v518_v8 }
 0x13d   : > { %1083 = vmatprep.subr.bf16.mxu1 %v1377_v0 }
 0x13f   : > { %1074 = vmatmul.mubr.msk.bf16.vlgmr.msra.gmra.mxu1 %vm473_vm1, %v464_v4 }
 0x140   : > { %1085 = vmatprep.mubr.msk.bf16.mxu1 %vm1378_vm0, %v1377_v0 }
 0x1ff   : > { %v553_v12 = vpop.f32.mrf.mxu1 }
 0x201   : > { %v1075_v13 = vpop.f32.mrf.mxu1 }
 0x203   : > { %v556_v14 = vpop.f32.mrf.mxu1 }
 0x204   : > { %v560_v15 = vpack.c.bf16 %v556_v14, %v553_v12 }
 0x205   : > { %v1076_v16 = vpop.f32.mrf.mxu1 }
 0x206   : > { %1080 = vmatmul.mubr.msk.bf16.vlgmr.msra.gmra.mxu0 %vm567_vm3, %v560_v15 }
 0x207   : > { %1091 = vmatprep.mubr.msk.bf16.mxu0 %vm1378_vm0, %v1377_v0 }
 0x2c6   : > { %v609_v17 = vpop.f32.mrf.mxu0 }
 0x2c7   : > { %v610_v21 = vadd.f32 %v1022_v18, %v609_v17 }
 0x2c8   : > { %v1081_v19 = vpop.f32.mrf.mxu0 }
 0x2ca   : > { %v612_v20 = vpop.f32.mrf.mxu0 }
 0x2cb   : > { %v613_v22 = vadd.f32 %v1022_v18, %v612_v20 }
 0x2cc   : > { %v1082_v23 = vpop.f32.mrf.mxu0 }
 0x2cd   : > { %v616_v24 = vpack.c.bf16 %v613_v22, %v610_v21 }
 0x2cf   : > { %1084 = vmatpush3.bf16.msra.mxu1 %v616_v24 }
 0x2d0   : > { %1095 = vmatprep.subr.bf16.mxu1 %v1377_v0 }
 0x2d2   : > { %1086 = vmatmul.mubr.msk.bf16.vlgmr.msra.gmra.mxu1 %vm473_vm1, %v464_v4 }
 0x2d3   : > { %1099 = vmatprep.mubr.msk.bf16.mxu1 %vm1378_vm0, %v1377_v0  ;;  %1096 = vmatpush3.bf16.msra.mxu1 %v1180_v30 }
 0x2d4   : > { %1097 = vmatprep.subr.bf16.mxu1 %v1377_v0 }
 0x2d7   : > { %1098 = vmatpush3.bf16.msra.mxu1 %v1181_v31 }
 0x392   : > { %v651_v25 = vpop.f32.mrf.mxu1 }
 0x394   : > { %v1087_v26 = vpop.f32.mrf.mxu1 }
 0x396   : > { %v654_v27 = vpop.f32.mrf.mxu1 }
 0x397   : > { %v658_v28 = vpack.c.bf16 %v654_v27, %v651_v25 }
 0x398   : > { %v1088_v29 = vpop.f32.mrf.mxu1 }
 0x399   : > { %1090 = vmatpush3.bf16.msra.mxu0 %v658_v28 }
 0x39c   : > { %1092 = vmatmul.mubr.msk.bf16.vlgmr.msra.gmra.mxu0 %vm473_vm1, %v464_v4 }
 0x45c   : > { %v693_v32 = vpop.f32.mrf.mxu0 }
 0x45e   : > { %v1093_v33 = vpop.f32.mrf.mxu0 }
 0x460   : > { %v696_v34 = vpop.f32.mrf.mxu0 }
 0x461   : > { %v700_v35 = vpack.c.bf16 %v696_v34, %v693_v32 }
 0x462   : > { %v1094_v36 = vpop.f32.mrf.mxu0 }
 0x463   : > { %1100 = vmatmul.mubr.msk.bf16.vlgmr.msra.gmra.mxu1 %vm719_vm4, %v700_v35 }
 0x523   : > { %v757_v38 = vpop.f32.mrf.mxu1 }
 0x524   : > { %v758_v39 = vadd.f32 %v1026_v37, %v757_v38 }
 0x525   : > { %v1101_v40 = vpop.f32.mrf.mxu1 }
 0x526   : > { %v764_v41 = vmul.f32 0.5, %v758_v39  ;;  %801 = vst.msk [vmem:[%s443_s4] sm:$0xff] %vm719_vm4, %v758_v39 }
 0x527   : > { %v760_v42 = vpop.f32.mrf.mxu1 }
 0x528   : > { %v766_v43 = vmul.f32 1.442695, %v764_v41  ;;  %v761_v44 = vadd.f32 %v1026_v37, %v760_v42 }
 0x529   : > { %v1102_v45 = vpop.f32.mrf.mxu1 }
 0x52a   : > { %1182 = vpow2.f32 %v766_v43  ;;  %v765_v46 = vmul.f32 0.5, %v761_v44  ;;  %802 = vst.msk [vmem:[%s443_s4 + $0x8] sm:$0xff] %vm719_vm4, %v761_v44 }
 0x52c   : > { %v768_v47 = vmul.f32 1.442695, %v765_v46 }
 0x52e   : > { %1184 = vpow2.f32 %v768_v47 }
 0x537   : > { %v1183_v48 = vpop.eup %1182 }
 0x538   : > { %778 = vrot.lane.b32.xlu0 %v1183_v48, %s1379_s27 }
 0x53b   : > { %v1185_v49 = vpop.eup %1184 }
 0x53c   : > { %780 = vrot.lane.b32.xlu0 %v1185_v49, %s1379_s27 }
 0x53d   : > { %1281 = shalt.err (!%p1278_p6)
}
 0x53e   : > { %s1282_s28 = scalar_lea.hbm %s1669_s19, 256  ;;  %s1286_s17 = scalar_lea.hbm %s1762_s9, 512 }
 0x53f   : > { %p1283_p12 = scmp.ne.s32.totalorder %s1669_s19, %s1282_s28  ;;  %p1287_p13 = scmp.lt.s32.totalorder %s1669_s19, %s1762_s9 }
 0x540   : > { %p1288_p3 = scmp.lt.s32.totalorder %s1286_s17, %s1282_s28 }
 0x541   : > { %p1284_p8 = pnand %p1283_p12, %p1791_p10 }
 0x542   : > { %p1289_p7 = por %p1288_p3, %p1287_p13 }
 0x543   : > { %p1285_p5 = pneg %p1284_p8 }
 0x545   : > { %p1290_p9 = pnand %p1289_p7, %p1285_p5 }
 0x547   : > { %1293 = shalt.err (!%p1290_p9)
}
 0x548   : > { %s1381_s29 = smov 128   ;;  %s1382_s14 = smov 8   ;;  %v770_v51 = vld [vmem:[%s385_s16] sm:$0xff]  ;;  %v771_v55 = vld [vmem:[%s385_s16 + $0x8] sm:$0xff]  ;;  %vm798_vm5 = vcmask 125952  }
 0x549   : > { %1112 = dma.vmem_to_hbm [thread:$0]  (%p1791_p10), %s1663_s23, 256, %s1669_s19, %s809_s1, %s1381_s29, %s1381_s29, %s1382_s14  }
 0x54a   : > { %s453_s28 = scalar_lea.vmem %s1755_s2, %s1042_s20  ;;  %s1013_s4 = sshll.u32 %s1606_s22, 3 }
 0x54b   : > { %v1049_v50 = vld [vmem:[%s453_s28] sm:$0xff]   ;;  %s1046_s11 = sshll.u32 %s1457_s13, 7  ;;  %s436_s20 = scalar_lea.vmem [#allocation8], %s1013_s4 }
 0x54c   : > { %v1050_v53 = vunpack.c.l.bf16 %v1049_v50  ;;  %v1051_v59 = vunpack.c.h.bf16 %v1049_v50  ;;  %s822_s23 = sshll.u32 %s436_s20, 4  ;;  %s1708_s15 = scalar_lea.hbm %s1761_s8, %s1046_s11  ;;  %s1710_s23 = int_to_ptr.vmem [resolvable:$true] %s822_s23 }
 0x54d   : > { %s804_s16 = scalar_lea.sflag [#allocation4], %s1606_s22  ;;  %s1294_s27 = scalar_lea.vmem %s1710_s23, 128 }
 0x54e   : > { %p1295_p2 = scmp.ne.s32.totalorder %s1710_s23, %s1294_s27  ;;  %s1383_s13 = smov [#allocation8]  }
 0x54f   : > { %s1298_s17 = sshll.u32 %s1383_s13, 4  ;;  %s1299_s17 = int_to_ptr.vmem [resolvable:$false] %s1298_s17 }
 0x550   : > { %p1296_p0 = pnand %p1295_p2, %p1791_p10  ;;  %s1300_s26 = scalar_lea.vmem %s1299_s17, 256 }
 0x551   : > { %p1301_p11 = scmp.lt.s32.totalorder %s1710_s23, %s1299_s17  ;;  %p1302_p1 = scmp.lt.s32.totalorder %s1300_s26, %s1294_s27 }
 0x552   : > { %p1297_p4 = pneg %p1296_p0 }
 0x553   : > { %p1303_p6 = por %p1302_p1, %p1301_p11 }
 0x555   : > { %p1304_p12 = pnand %p1303_p6, %p1297_p4 }
 0x5aa   : > { %v779_v52 = vpop.permute.xlu0 %778 }
 0x5ab   : > { %v784_v54 = vmul.f32 %v779_v52, %v770_v51 }
 0x5ad   : > { %v786_v56 = vadd.f32 %v784_v54, %v758_v39 }
 0x5ae   : > { %v781_v57 = vpop.permute.xlu0 %780 }
 0x5af   : > { %v788_v58 = vmul.f32 %v1050_v53, %v786_v56  ;;  %v785_v60 = vmul.f32 %v781_v57, %v771_v55 }
 0x5b1   : > { %v1044_v61 = vpack.c.bf16 %v788_v58, %v788_v58  ;;  %v787_v62 = vadd.f32 %v785_v60, %v761_v44 }
 0x5b3   : > { %799 = vst.msk [vmem:[%s436_s20] sm:$0xf] %vm798_vm5, %v1044_v61  ;;  %v789_v63 = vmul.f32 %v1051_v59, %v787_v62 }
 0x5b5   : > { %v1045_v0 = vpack.c.bf16 %v789_v63, %v789_v63 }
 0x5b7   : > { %800 = vst.msk [vmem:[%s436_s20 + $0x4] sm:$0xf] %vm798_vm5, %v1045_v0 }
 0x5b8   : > { %1307 = shalt.err (!%p1304_p12)
}
 0x5b9   : > { %s1308_s24 = scalar_lea.hbm %s1708_s15, 128  ;;  %s1312_s25 = scalar_lea.hbm %s1761_s8, 256 }
 0x5ba   : > { %p1309_p8 = scmp.ne.s32.totalorder %s1708_s15, %s1308_s24  ;;  %p1313_p3 = scmp.lt.s32.totalorder %s1708_s15, %s1761_s8 }
 0x5bb   : > { %p1314_p7 = scmp.lt.s32.totalorder %s1312_s25, %s1308_s24 }
 0x5bc   : > { %p1310_p5 = pnand %p1309_p8, %p1791_p10 }
 0x5bd   : > { %p1315_p9 = por %p1314_p7, %p1313_p3 }
 0x5be   : > { %p1311_p13 = pneg %p1310_p5 }
 0x5c0   : > { %p1316_p2 = pnand %p1315_p9, %p1311_p13 }
 0x5c2   : > { %1319 = shalt.err (!%p1316_p2)
}
 0x5c3   : > { %s1384_s4 = smov 64   ;;  %s1385_s11 = smov 4  }
 0x5c4   : > { %1111 = dma.vmem_to_hbm [thread:$0]  (%p1791_p10), %s1710_s23, 128, %s1708_s15, %s804_s16, %s1384_s4, %s1384_s4, %s1385_s11  }
 0x5c5 PF: > { %s1792_s20 = sld [smem:[#allocation19_spill]]  ;;  %s853_s19 = sand.u32 1, %s1358_s30  }
 0x5c6   : > { %p1794_p4 = scmp.ge.s32.totalorder %s1370_s12, 2  ;;  %s854_s1 = scalar_lea.sflag [#allocation4], %s853_s19 }
 0x5cb   : > { %p1793_p0 = scmp.ne.s32.totalorder %s1792_s20, 0 }
 0x5cd   : > { %p1127_p11 = pnand %p1794_p4, %p1793_p0 }
 0x5cf   : > { %p1128_p1 = pneg %p1127_p11 }
 0x5d1   : > { %1349 = dma.done.wait (%p1128_p1), %s854_s1, 128  }
 0x5d2   : > { %1351 = vsyncadd (%p1128_p1), %s854_s1, 4294967168  ;;  %s863_s27 = scalar_lea.sflag [#allocation10], %s853_s19 }
 0x5d3   : > { %1353 = dma.done.wait (%p1128_p1), %s863_s27, 256  }
 0x5d4   : > { %1355 = vsyncadd (%p1128_p1), %s863_s27, 4294967040  ;;  %s1795_s12 = sld [smem:[#allocation17_spill]]  ;;  %s1798_s30 = smov %s1362_s10 }
 0x5d5   : > { %s1796_s21 = sld [smem:[#allocation16_spill]] }
 0x5d6   : > { %s1797_s11 = sld [smem:[#allocation18_spill]] }
 0x5da   : > { %p29_p10 = scmp.ge.s32.totalorder %s1795_s12, 4  }
 0x5db   : > { %s1799_s10 = smov %s1796_s21 }
 0x5dc   :  { %31 = sbr.rel (!%p29_p10) target bundleno = 12 (0xc), region = 137 }
 0x5e1   :  { %868 = vsyncpa [#allocation3], 1 }
 0x5e2   :  { %870 = vsyncpa [#allocation3 + $0x1], 1 }
 0x5e3   :  { %871 = vsyncpa [#allocation6], 1 }
 0x5e4   :  { %873 = vsyncpa [#allocation6 + $0x1], 1 }
 0x5e5   :  { %874 = vsyncpa [#allocation4], 1 }
 0x5e6   :  { %876 = vsyncpa [#allocation4 + $0x1], 1 }
 0x5e7   :  { %877 = vsyncpa [#allocation10], 1 }
 0x5e8   :  { %879 = vsyncpa [#allocation10 + $0x1], 1 }

</bundles_post_ra>
